<compile_context>
chip_gen: v5e
topology: v5e:2x2
jax: 0.10.0
libtpu: 0.0.40
codegen_flags: <defaults>
</compile_context>

<pallas_src>
import jax
import jax.numpy as jnp
from jax import lax
from jax.experimental import pallas as pl
from jax.experimental.pallas import tpu as pltpu


def embed_proj_kernel(idx_ref, table_hbm, w_ref, out_ref, gbuf, sem):
    """Fused embedding gather + bias-free projection for one tile of Nt tokens.

    idx_ref   : (N_pad,) int32  SMEM (scalar prefetch) — flattened token ids
    table_hbm : (V, E)   f32    HBM (pl.ANY)           — embedding table
    w_ref     : (H, E)   f32    VMEM                   — nn.Linear weight (native layout)
    out_ref   : (Nt, H)  f32    VMEM                   — projected embeddings tile
    gbuf      : (Nt, E)  f32    VMEM scratch           — gathered embedding rows
    sem       :          DMA semaphore
    """
    nt = gbuf.shape[0]
    base = pl.program_id(0) * nt

    # Issue all row DMAs first (gather from HBM into VMEM), then drain.
    # All SMEM index reads happen before any .wait().
    @pl.loop(0, nt)
    def _issue(r):
        tok = idx_ref[base + r]
        pltpu.make_async_copy(
            table_hbm.at[pl.ds(tok, 1), :],
            gbuf.at[pl.ds(r, 1), :],
            sem,
        ).start()

    @pl.loop(0, nt)
    def _drain(r):
        # Wait descriptor only needs a shape-matching dst + the semaphore.
        pltpu.make_async_copy(
            table_hbm.at[pl.ds(0, 1), :],
            gbuf.at[pl.ds(r, 1), :],
            sem,
        ).wait()

    # (Nt, E) @ (H, E)^T on the MXU, contracting on E, f32 accumulation.
    out_ref[...] = lax.dot_general(
        gbuf[...], w_ref[...],
        dimension_numbers=(((1,), (1,)), ((), ())),
        preferred_element_type=jnp.float32,
    ).astype(out_ref.dtype)


def embedding_forward(x, word_vectors, w_proj, *, n_tile=128):
    """JAX wrapper reproducing Embedding.forward.

    x            : (B, S) int32  token indices
    word_vectors : (V, E) float32 pre-trained embedding table
    w_proj       : (H, E) float32 (same layout as torch nn.Linear.weight; y = emb @ w_proj.T)
    returns      : (B, S, H) float32
    """
    B, S = x.shape
    V, E = word_vectors.shape
    H, E2 = w_proj.shape
    assert E == E2, "projection weight must be (hidden, embed_dim)"
    N = B * S

    # MXU/sublane-friendly token tile: 128 at scale, otherwise round N up to 8.
    if N >= n_tile:
        nt = n_tile
    else:
        nt = ((N + 7) // 8) * 8
    n_tiles = (N + nt - 1) // nt
    n_pad = n_tiles * nt

    idx = x.reshape(-1).astype(jnp.int32)
    if n_pad != N:
        idx = jnp.concatenate(
            [idx, jnp.zeros((n_pad - N,), dtype=jnp.int32)])  # pad with valid id 0

    out = pl.pallas_call(
        embed_proj_kernel,
        out_shape=jax.ShapeDtypeStruct((n_pad, H), jnp.float32),
        grid_spec=pltpu.PrefetchScalarGridSpec(
            num_scalar_prefetch=1,              # idx -> SMEM, visible to index_maps too
            grid=(n_tiles,),
            in_specs=[
                pl.BlockSpec(memory_space=pl.ANY),            # table stays in HBM
                pl.BlockSpec((H, E), lambda i, idx: (0, 0)),  # weight resident in VMEM
            ],
            out_specs=pl.BlockSpec((nt, H), lambda i, idx: (i, 0)),
            scratch_shapes=[
                pltpu.VMEM((nt, E), word_vectors.dtype),      # gathered rows
                pltpu.SemaphoreType.DMA(()),
            ],
        ),
        compiler_params=pltpu.CompilerParams(
            dimension_semantics=("parallel",)),               # split N tiles across TCs (v7x)
    )(idx, word_vectors, w_proj)

    return out[:N].reshape(B, S, H)


if __name__ == "__main__":
    key = jax.random.PRNGKey(0)
    k_wv, k_w, k_x = jax.random.split(key, 3)

    # Small shapes consistent with the module: batch=2, seq=8, vocab=64,
    # word-vector dim=32, hidden=64.
    B, S = 2, 8
    V, E, H = 64, 32, 64

    # Deterministic "pre-trained" word vectors and Linear weight (no bias).
    word_vectors = jax.random.normal(k_wv, (V, E), dtype=jnp.float32)
    bound = 1.0 / (E ** 0.5)  # torch nn.Linear default init range
    w_proj = jax.random.uniform(k_w, (H, E), minval=-bound, maxval=bound,
                                dtype=jnp.float32)
    x = jax.random.randint(k_x, (B, S), 0, V, dtype=jnp.int32)

    out = embedding_forward(x, word_vectors, w_proj)
    out = jax.block_until_ready(out)

    # Pure-JAX reference for the exact forward semantics.
    ref = jnp.take(word_vectors, x, axis=0) @ w_proj.T
    assert out.shape == (B, S, H)
    assert jnp.allclose(out, ref, atol=1e-5, rtol=1e-5), "mismatch vs reference"

    print("KERNEL_OK")
</pallas_src>

<mosaic_0001>
module attributes {stable_mosaic.version = 11 : i64} {
  func.func @embed_proj_kernel(%arg0: i32, %arg1: memref<16xi32, #tpu.memory_space<smem>>, %arg2: memref<64x32xf32, #tpu.memory_space<any>>, %arg3: memref<64x32xf32, #tpu.memory_space<vmem>>, %arg4: memref<16x64xf32, #tpu.memory_space<vmem>>, %arg5: memref<16x32xf32, #tpu.memory_space<vmem>>, %arg6: memref<!tpu.dma_semaphore, #tpu.memory_space<semaphore_mem>>) attributes {dimension_semantics = [#tpu.dimension_semantics<parallel>], iteration_bounds = array<i64: 1>, scalar_prefetch = 1 : i64, scratch_operands = 2 : i64, tpu.core_type = #tpu.core_type<tc>, window_params = [{}, {pipeline_mode = #tpu.pipeline_mode<synchronous>, transform_indices = @transform_1, window_bounds = array<i64: 64, 32>}, {transform_indices = @transform_2, window_bounds = array<i64: 16, 64>}]} {
    %c16_i32 = arith.constant 16 : i32
    %0 = arith.muli %arg0, %c16_i32 : i32
    %c0_i32 = arith.constant 0 : i32
    %c16_i32_0 = arith.constant 16 : i32
    %1 = arith.addi %c0_i32, %c16_i32_0 : i32
    %c1_i32 = arith.constant 1 : i32
    scf.for %arg7 = %c0_i32 to %1 step %c1_i32  : i32 {
      %c1_i32_11 = arith.constant 1 : i32
      %7 = arith.muli %arg7, %c1_i32_11 : i32
      %c0_i32_12 = arith.constant 0 : i32
      %8 = arith.addi %c0_i32_12, %7 : i32
      %9 = arith.addi %0, %8 : i32
      %10 = arith.index_cast %9 : i32 to index
      %11 = memref.load %arg1[%10] : memref<16xi32, #tpu.memory_space<smem>>
      %c0_i32_13 = arith.constant 0 : i32
      %12 = tpu.memref_slice %arg2[%11, %c0_i32_13] : memref<64x32xf32, #tpu.memory_space<any>> -> memref<1x32xf32, #tpu.memory_space<any>>
      %c0_i32_14 = arith.constant 0 : i32
      %13 = tpu.memref_slice %arg5[%8, %c0_i32_14] : memref<16x32xf32, #tpu.memory_space<vmem>> -> memref<1x32xf32, #tpu.memory_space<vmem>>
      tpu.enqueue_dma source(%12 : memref<1x32xf32, #tpu.memory_space<any>>) target(%13 : memref<1x32xf32, #tpu.memory_space<vmem>>) target_semaphore(%arg6 : memref<!tpu.dma_semaphore, #tpu.memory_space<semaphore_mem>>)
    }
    %c16_i32_1 = arith.constant 16 : i32
    %c0_i32_2 = arith.constant 0 : i32
    %c16_i32_3 = arith.constant 16 : i32
    %2 = arith.addi %c0_i32_2, %c16_i32_3 : i32
    %c1_i32_4 = arith.constant 1 : i32
    scf.for %arg7 = %c0_i32_2 to %2 step %c1_i32_4  : i32 {
      %c1_i32_11 = arith.constant 1 : i32
      %7 = arith.muli %arg7, %c1_i32_11 : i32
      %c0_i32_12 = arith.constant 0 : i32
      %8 = arith.addi %c0_i32_12, %7 : i32
      %c0_i32_13 = arith.constant 0 : i32
      %c0_i32_14 = arith.constant 0 : i32
      %9 = tpu.memref_slice %arg2[%c0_i32_13, %c0_i32_14] : memref<64x32xf32, #tpu.memory_space<any>> -> memref<1x32xf32, #tpu.memory_space<any>>
      %c0_i32_15 = arith.constant 0 : i32
      %10 = tpu.memref_slice %arg5[%8, %c0_i32_15] : memref<16x32xf32, #tpu.memory_space<vmem>> -> memref<1x32xf32, #tpu.memory_space<vmem>>
      tpu.wait_dma2 semaphore(%arg6 : memref<!tpu.dma_semaphore, #tpu.memory_space<semaphore_mem>>) src(%9 : memref<1x32xf32, #tpu.memory_space<any>>) dst(%10 : memref<1x32xf32, #tpu.memory_space<vmem>>)
    }
    %c16_i32_5 = arith.constant 16 : i32
    %c0 = arith.constant 0 : index
    %c0_6 = arith.constant 0 : index
    %3 = vector.load %arg5[%c0, %c0_6] : memref<16x32xf32, #tpu.memory_space<vmem>>, vector<16x32xf32>
    %c0_7 = arith.constant 0 : index
    %c0_8 = arith.constant 0 : index
    %4 = vector.load %arg3[%c0_7, %c0_8] : memref<64x32xf32, #tpu.memory_space<vmem>>, vector<64x32xf32>
    %cst = arith.constant dense<0.000000e+00> : vector<16x64xf32>
    %5 = tpu.matmul %3, %4, %cst {dimension_numbers = #tpu.dot_dimension_numbers<[1], [1], [0], [0], [0, 0, 1, 0], [], []>} : vector<16x32xf32>, vector<64x32xf32>, vector<16x64xf32> -> vector<16x64xf32>
    %c0_9 = arith.constant 0 : index
    %c0_10 = arith.constant 0 : index
    %6 = vector.load %arg4[%c0_9, %c0_10] : memref<16x64xf32, #tpu.memory_space<vmem>>, vector<16x64xf32>
    tpu.vector_store %arg4[%c0_9, %c0_10], %5 {strides = array<i32>} : memref<16x64xf32, #tpu.memory_space<vmem>>, vector<16x64xf32>,
    return
  }
  func.func @transform_1(%arg0: i32, %arg1: memref<16xi32, #tpu.memory_space<smem>>) -> (i32, i32) {
    %c0_i32 = arith.constant 0 : i32
    %c0_i32_0 = arith.constant 0 : i32
    %c0_i32_1 = arith.constant 0 : i32
    return %c0_i32, %c0_i32_0 : i32, i32
  }
  func.func @transform_2(%arg0: i32, %arg1: memref<16xi32, #tpu.memory_space<smem>>) -> (i32, i32) {
    %c0_i32 = arith.constant 0 : i32
    %c0_i32_0 = arith.constant 0 : i32
    return %arg0, %c0_i32 : i32, i32
  }
}

</mosaic_0001>

<bundles_post_ra>
// kernel: tpu_custom_call.1
= control target key start
LH: loop header
LB: loop body
LE: loop exit
PB: predicated region body
PF: predicated region fallthrough
CT: control target
= control target key end

     0   :  { %s277_s15 = smov [#allocation5]   ;;  %s352_s0 = inlined_call_operand.vmem [shape: s32[16], index: 0, kind: input, shape index: {}]   ;;  %s353_s1 = inlined_call_operand.vmem [shape: f32[64,32], index: 1, kind: input, shape index: {}]   ;;  %s354_s2 = inlined_call_operand.vmem [shape: f32[64,32], index: 2, kind: input, shape index: {}]   ;;  %s355_s3 = inlined_call_operand.hbm [shape: f32[16,64], index: 3, kind: output, shape index: {}]  }
   0x1   :  { %s9_s14 = sshll.u32 %s352_s0, 4  ;;  %s10_s14 = int_to_ptr.vmem [resolvable:$true] %s9_s14 }
   0x2   :  { %12 = dma.vmem_to_smem %s10_s14, 16, %s277_s15, [#allocation4] }
   0x3   :  { %263 = dma.done.wait [#allocation4], 16 }
   0x4   :  { %264 = vsyncadd [#allocation4], 4294967280 }
   0x5   :  { %15 = sfence }
   0x6   :  { %16 = vsyncpa [#allocation7], 0  ;;  %s269_s16 = smov 0  }
   0x7 LB: > { %s27_s17 = sld [smem:[#allocation5 + %s271_s16]]  ;;  %s29_s21 = scalar_lea.vmem [#allocation2], %s271_s16  ;;  %s271_s16 = sphi %s269_s16, %s25_s16  }
   0xd   : > { %s28_s20 = scalar_lea.vmem %s353_s1, %s27_s17 }
   0xe   : > { %v44_v0 = vld [vmem:[%s28_s20] sm:$0x1] }
   0xf   : > { %45 = vst [vmem:[%s29_s21] sm:$0x1] %v44_v0 }
  0x10   : > { %63 = vsyncadd [#allocation3], 16  ;;  %s25_s16 = sadd.s32 1, %s271_s16  }
  0x11   : > { %p22_p0 = scmp.ge.s32.totalorder %s25_s16, 16  }
  0x12   :  { %s273_s0 = smov (%p22_p0), 0  }
  0x13   :  { %24 = sbr.rel (!%p22_p0) target bundleno = 7 (0x7), region = 74 }
  0x18 LB: > { %265 = dma.done.wait [#allocation3], 16  ;;  %s275_s0 = sphi %s273_s0, %s69_s0  }
  0x19   : > { %266 = vsyncadd [#allocation3], 4294967280  ;;  %s69_s0 = sadd.s32 1, %s275_s0  }
  0x1a   : > { %p66_p1 = scmp.ge.s32.totalorder %s69_s0, 16  }
  0x1b   :  { %v82_v1 = vld [vmem:[%s354_s2 + $0x38] sm:$0xff] (%p66_p1)  ;;  %vm83_vm0 = vcmask (%p66_p1), 261120   ;;  %v81_v2 = vld [vmem:[%s354_s2 + $0x30] sm:$0xff] (%p66_p1)  ;;  %v80_v3 = vld [vmem:[%s354_s2 + $0x28] sm:$0xff] (%p66_p1)  ;;  %s278_s10 = smov (%p66_p1), [#allocation6]   ;;  %s146_s14 = sshll.u32 (%p66_p1), %s355_s3, 4  ;;  %s147_s14 = int_to_ptr.hbm [resolvable:$true] %s146_s14 }
  0x1c   :  { %68 = sbr.rel (!%p66_p1) target bundleno = 24 (0x18), region = 85  ;;  %180 = vmatpush.xpose.msk.msra.mxu0 (%p66_p1), %vm83_vm0, %v82_v1  ;;  %191 = vmatpush.xpose.msk.msra.mxu1 (%p66_p1), %vm83_vm0, %v82_v1  ;;  %v79_v4 = vld [vmem:[%s354_s2 + $0x20] sm:$0xff] (%p66_p1)  ;;  %v78_v5 = vld [vmem:[%s354_s2 + $0x18] sm:$0xff] (%p66_p1)  ;;  %v77_v6 = vld [vmem:[%s354_s2 + $0x10] sm:$0xff] (%p66_p1)  ;;  %s144_s11 = sshll.u32 (%p66_p1), %s278_s10, 4  ;;  %vm137_vm1 = vcmask (%p66_p1), 523264   ;;  %s145_s11 = int_to_ptr.vmem [resolvable:$true] %s144_s11 }
  0x1d   :  { %v76_v7 = vld [vmem:[%s354_s2 + $0x8] sm:$0xff] (%p66_p1)  ;;  %v75_v8 = vld [vmem:[%s354_s2] sm:$0xff] (%p66_p1)  ;;  %s279_s2 = smov (%p66_p1), 128   ;;  %s280_s15 = smov (%p66_p1), 8  }
  0x1e   :  { %v73_v9 = vld [vmem:[#allocation2] sm:$0xff] (%p66_p1)  ;;  %v74_v10 = vld [vmem:[#allocation2 + $0x8] sm:$0xff] (%p66_p1) }
  0x20   :  { %181 = vmatpush.xpose.msk.msra.mxu0 (%p66_p1), %vm83_vm0, %v81_v2  ;;  %192 = vmatpush.xpose.msk.msra.mxu1 (%p66_p1), %vm83_vm0, %v81_v2 }
  0x24   :  { %182 = vmatpush.xpose.msk.msra.mxu0 %vm83_vm0, %v80_v3  ;;  %193 = vmatpush.xpose.msk.msra.mxu1 %vm83_vm0, %v80_v3 }
  0x28   :  { %183 = vmatpush.xpose.msk.msra.mxu0 %vm83_vm0, %v79_v4  ;;  %194 = vmatpush.xpose.msk.msra.mxu1 %vm83_vm0, %v79_v4 }
  0x2c   :  { %184 = vmatpush.xpose.msk.msra.mxu0 %vm83_vm0, %v78_v5  ;;  %195 = vmatpush.xpose.msk.msra.mxu1 %vm83_vm0, %v78_v5 }
  0x30   :  { %185 = vmatpush.xpose.msk.msra.mxu0 %vm83_vm0, %v77_v6  ;;  %196 = vmatpush.xpose.msk.msra.mxu1 %vm83_vm0, %v77_v6 }
  0x34   :  { %186 = vmatpush.xpose.msk.msra.mxu0 %vm83_vm0, %v76_v7  ;;  %197 = vmatpush.xpose.msk.msra.mxu1 %vm83_vm0, %v76_v7 }
  0x38   :  { %187 = vmatpush.xpose.msk.msra.mxu0 %vm83_vm0, %v75_v8  ;;  %198 = vmatpush.xpose.msk.msra.mxu1 %vm83_vm0, %v75_v8 }
  0x3b   :  { %188 = vmatmul.msk.f32.vlgmr.msra.gmra.mxu0 %vm83_vm0, %v73_v9  ;;  %189 = vmatmul.msk.f32.vlgmr.msra.gmra.mxu1 %vm83_vm0, %v74_v10 }
  0xb8   :  { %v131_v11 = vpop.f32.mrf.mxu0  ;;  %v134_v12 = vpop.f32.mrf.mxu1 }
  0xb9   :  { %138 = vst.msk [vmem:[#allocation6] sm:$0xff] %vm137_vm1, %v131_v11 }
  0xba   :  { %139 = vst.msk [vmem:[#allocation6 + $0x8] sm:$0xff] %vm137_vm1, %v134_v12 }
  0xbb   :  { %152 = dma.vmem_to_hbm [thread:$0]  %s145_s11, 256, %s147_s14, [#allocation7], %s279_s2, %s279_s2, %s280_s15  }
  0xbc   :  { %267 = dma.done.wait [#allocation7], 256  }
  0xbd   :  { %268 = vsyncadd [#allocation7], 4294967040 }
  0xbe   :  { %157 = vsyncpa [#allocation7], 1 }
  0xbf   :  { %158 = vsyncmov [#allocation3] }
  0xc2   :  { %s159_s16 = vpop.sfrf %158 }
  0xc3   :  { %p190_p2 = scmp.ne.s32.totalorder %s159_s16, 0 }
  0xc5   :  { %163 = shalt.err (%p190_p2)  }

</bundles_post_ra>
